<compile_context>
chip_gen: v5e
topology: v5e:2x2
jax: 0.10.0
libtpu: 0.0.40
codegen_flags: <defaults>
</compile_context>

<pallas_src>
import functools
import numpy as np
import jax
import jax.numpy as jnp
from jax.experimental import pallas as pl
from jax.experimental.pallas import tpu as pltpu


def _round_up(x, m):
    return ((x + m - 1) // m) * m


# ----------------------------------------------------------------------------
# One-time parameter prep (outside the per-episode path):
#   pick K tiling from W's shape, cast to bf16 FIRST, then pad.
# ----------------------------------------------------------------------------
def prepare_backbone_params(w, b, *, tk_cap=4096, vmem_w_budget=36 * 1024 * 1024):
    f_in, d = int(w.shape[0]), int(w.shape[1])
    d_pad = _round_up(d, 128)
    f_128 = _round_up(f_in, 128)
    # double-buffered bf16 W tile: 2 * tk * d_pad * 2 bytes <= budget (v7x-safe)
    tk_budget = max(128, (vmem_w_budget // (4 * d_pad)) // 128 * 128)
    tk = min(f_128, tk_cap, tk_budget)
    f_pad = _round_up(f_in, tk)

    w_p = jnp.pad(w.astype(jnp.bfloat16), ((0, f_pad - f_in), (0, d_pad - d)))
    b_p = jnp.pad(b.astype(jnp.float32), (0, d_pad - d)).reshape(1, d_pad)
    geom = dict(f_in=f_in, d=d, tk=tk, f_pad=f_pad, d_pad=d_pad)
    return w_p, b_p, geom


# ----------------------------------------------------------------------------
# Fused kernel:
#   grid = (K tiles,)   (single M tile; W streamed exactly once)
#     k-loop:   acc += x[:, k*tk : (k+1)*tk] @ W_tile        (bf16 MXU, f32 acc)
#     epilogue: z = relu(acc + b)
#               protos^T = z_support^T @ onehot_scaled       (1/count folded in)
#               scores   = -( ||q||^2 + ||p||^2 - 2 q.p )
# ----------------------------------------------------------------------------
def fused_protonet_kernel(x_ref, w_ref, b_ref, onehot_ref, scores_ref, acc_ref,
                          *, tk, s_pad, q_pad):
    k = pl.program_id(0)

    @pl.when(k == 0)
    def _():
        acc_ref[...] = jnp.zeros_like(acc_ref)

    start = pl.multiple_of(k * tk, 128)
    x_chunk = x_ref[:, pl.ds(start, tk)]                     # resident x, no per-step DMA
    acc_ref[...] += jnp.dot(x_chunk, w_ref[...],
                            preferred_element_type=jnp.float32)

    @pl.when(k == pl.num_programs(0) - 1)
    def _():
        z = jnp.maximum(acc_ref[...] + b_ref[...], 0.0)      # (m_pad, d_pad) f32
        zs = z[0:s_pad, :]                                   # (s_pad, d_pad)
        zq = z[s_pad:s_pad + q_pad, :]                       # (q_pad, d_pad)

        # prototypes, transposed layout (d_pad, w_lane): zero one-hot rows for
        # padded support rows keep relu(b) garbage out of the prototypes.
        protos_t = jax.lax.dot_general(
            zs, onehot_ref[...], (((0,), (0,)), ((), ())),
            preferred_element_type=jnp.float32)

        cross = jnp.dot(zq, protos_t, preferred_element_type=jnp.float32)   # (q_pad, w_lane)
        q_sq = jnp.sum(zq * zq, axis=-1, keepdims=True)                     # (q_pad, 1)
        p_sq = jnp.sum(protos_t * protos_t, axis=0, keepdims=True)          # (1, w_lane)

        scores_ref[...] = (-(q_sq + p_sq - 2.0 * cross)).astype(scores_ref.dtype)


# ----------------------------------------------------------------------------
# PrototypicalNetworks.forward (head='ProtoNet', both=False)
# NOTE: support_labels are consumed with np.unique at trace time (mirrors
#       torch.unique); this wrapper is not jit-able over the labels argument.
# ----------------------------------------------------------------------------
def prototypical_networks_forward(support_images, support_labels, query_images,
                                  prepared_params):
    w_p, b_p, geom = prepared_params
    f_in, tk, f_pad, d_pad = geom["f_in"], geom["tk"], geom["f_pad"], geom["d_pad"]

    s = support_images.shape[0]
    q = query_images.shape[0]
    assert int(np.prod(support_images.shape[1:])) == f_in
    assert int(np.prod(query_images.shape[1:])) == f_in

    s_pad = _round_up(s, 8)
    q_pad = _round_up(q, 8)
    m_pad = _round_up(s_pad + q_pad, 16)                     # single M tile, bf16 sublanes

    # bf16-first host prep: cast, then pad/concat (no f32 staging copies).
    xs = support_images.reshape(s, -1).astype(jnp.bfloat16)
    xq = query_images.reshape(q, -1).astype(jnp.bfloat16)
    x_all = jnp.concatenate([
        jnp.pad(xs, ((0, s_pad - s), (0, f_pad - f_in))),
        jnp.pad(xq, ((0, m_pad - s_pad - q), (0, f_pad - f_in))),
    ], axis=0)                                               # (m_pad, f_pad) bf16

    # label-remapped, 1/count-scaled one-hot (concrete labels, no divide/NaN).
    labels_np = np.asarray(support_labels).reshape(-1)
    classes = np.unique(labels_np)
    n_way = int(classes.shape[0])
    w_lane = _round_up(n_way, 128)                           # lane-dense head output
    onehot = np.zeros((s_pad, w_lane), np.float32)
    for col, c in enumerate(classes):
        idx = np.where(labels_np == c)[0]
        onehot[idx, col] = 1.0 / float(idx.shape[0])
    onehot = jnp.asarray(onehot)

    kernel = functools.partial(fused_protonet_kernel, tk=tk, s_pad=s_pad, q_pad=q_pad)

    scores_pad = pl.pallas_call(
        kernel,
        out_shape=jax.ShapeDtypeStruct((q_pad, w_lane), jnp.float32),
        grid_spec=pltpu.PrefetchScalarGridSpec(
            num_scalar_prefetch=0,
            grid=(f_pad // tk,),
            in_specs=[
                pl.BlockSpec((m_pad, f_pad), lambda k: (0, 0)),    # x resident in VMEM
                pl.BlockSpec((tk, d_pad), lambda k: (k, 0)),       # W streamed once
                pl.BlockSpec((1, d_pad), lambda k: (0, 0)),        # bias resident
                pl.BlockSpec((s_pad, w_lane), lambda k: (0, 0)),   # one-hot resident
            ],
            out_specs=pl.BlockSpec((q_pad, w_lane), lambda k: (0, 0)),
            scratch_shapes=[pltpu.VMEM((m_pad, d_pad), jnp.float32)],
        ),
        compiler_params=pltpu.CompilerParams(
            dimension_semantics=("arbitrary",),
            vmem_limit_bytes=48 * 1024 * 1024),                    # v7x-safe (64 MiB physical)
    )(x_all, w_p, b_p, onehot)

    return scores_pad[:q, :n_way]


# ----------------------------------------------------------------------------
# pure-JAX reference (same bf16 MXU quantization of the backbone as the kernel)
# ----------------------------------------------------------------------------
def _reference(support_images, support_labels, query_images, backbone_params):
    w, b = backbone_params

    def bk(x):
        xf = x.reshape(x.shape[0], -1).astype(jnp.bfloat16)
        y = jnp.dot(xf, w.astype(jnp.bfloat16),
                    preferred_element_type=jnp.float32) + b
        return jnp.maximum(y, 0.0)

    zs, zq = bk(support_images), bk(query_images)
    labels = np.asarray(support_labels).reshape(-1)
    classes = np.unique(labels)
    protos = jnp.stack([zs[labels == c].mean(0) for c in classes])
    d2 = jnp.sum((zq[:, None, :] - protos[None, :, :]) ** 2, axis=-1)
    return -d2


if __name__ == "__main__":
    key = jax.random.PRNGKey(0)
    k1, k2, k3, k4 = jax.random.split(key, 4)

    # small episode: 2-way, 4-shot, 6 queries; images NCHW (3, 8, 8)
    C, H, W = 3, 8, 8
    n_way, n_shot, n_query = 2, 4, 6
    feat_in, feat_dim = C * H * W, 128

    support_images = jax.random.normal(k1, (n_way * n_shot, C, H, W), jnp.float32)
    query_images = jax.random.normal(k2, (n_query, C, H, W), jnp.float32)
    # non-contiguous class ids to exercise the label-remapping path
    support_labels = jnp.array([5, 5, 5, 5, 2, 2, 2, 2], dtype=jnp.int32)

    # deterministic backbone parameters
    w = (jax.random.normal(k3, (feat_in, feat_dim), jnp.float32)
         / jnp.sqrt(jnp.float32(feat_in)))
    b = 0.01 * jax.random.normal(k4, (feat_dim,), jnp.float32)

    # parameter padding/casting happens ONCE, outside the forward path
    prepared = prepare_backbone_params(w, b)

    scores = prototypical_networks_forward(
        support_images, support_labels, query_images, prepared)
    scores = jax.block_until_ready(scores)

    ref = _reference(support_images, support_labels, query_images, (w, b))
    assert scores.shape == (n_query, n_way)
    np.testing.assert_allclose(np.asarray(scores), np.asarray(ref),
                               rtol=2e-3, atol=2e-2)
    print("KERNEL_OK")
</pallas_src>

<mosaic_0001>
module attributes {stable_mosaic.version = 11 : i64} {
  func.func @fused_protonet_kernel(%arg0: i32, %arg1: memref<16x256xbf16, #tpu.memory_space<vmem>>, %arg2: memref<256x128xbf16, #tpu.memory_space<vmem>>, %arg3: memref<1x128xf32, #tpu.memory_space<vmem>>, %arg4: memref<8x128xf32, #tpu.memory_space<vmem>>, %arg5: memref<8x128xf32, #tpu.memory_space<vmem>>, %arg6: memref<16x128xf32, #tpu.memory_space<vmem>>) attributes {dimension_semantics = [#tpu.dimension_semantics<arbitrary>], iteration_bounds = array<i64: 1>, scalar_prefetch = 0 : i64, scratch_operands = 1 : i64, tpu.core_type = #tpu.core_type<tc>, window_params = [{pipeline_mode = #tpu.pipeline_mode<synchronous>, transform_indices = @transform_0, window_bounds = array<i64: 16, 256>}, {transform_indices = @transform_1, window_bounds = array<i64: 256, 128>}, {pipeline_mode = #tpu.pipeline_mode<synchronous>, transform_indices = @transform_2, window_bounds = array<i64: 1, 128>}, {pipeline_mode = #tpu.pipeline_mode<synchronous>, transform_indices = @transform_3, window_bounds = array<i64: 8, 128>}, {pipeline_mode = #tpu.pipeline_mode<synchronous>, transform_indices = @transform_4, window_bounds = array<i64: 8, 128>}]} {
    %c0_i32 = arith.constant 0 : i32
    %0 = arith.cmpi eq, %arg0, %c0_i32 : i32
    %1 = arith.extui %0 : i1 to i32
    %c0_i32_0 = arith.constant 0 : i32
    %2 = arith.cmpi ne, %1, %c0_i32_0 : i32
    scf.if %2 {
      %cst_9 = arith.constant 0.000000e+00 : f32
      %15 = vector.broadcast %cst_9 : f32 to vector<16x128xf32>
      %c0_10 = arith.constant 0 : index
      %c0_11 = arith.constant 0 : index
      %16 = vector.load %arg6[%c0_10, %c0_11] : memref<16x128xf32, #tpu.memory_space<vmem>>, vector<16x128xf32>
      tpu.vector_store %arg6[%c0_10, %c0_11], %15 {strides = array<i32>} : memref<16x128xf32, #tpu.memory_space<vmem>>, vector<16x128xf32>,
    } else {
    }
    %c256_i32 = arith.constant 256 : i32
    %3 = arith.muli %arg0, %c256_i32 : i32
    %4 = tpu.assume_multiple %3, 128 : i32
    %c0 = arith.constant 0 : index
    %5 = arith.index_cast %4 : i32 to index
    %6 = vector.load %arg1[%c0, %5] : memref<16x256xbf16, #tpu.memory_space<vmem>>, vector<16x256xbf16>
    %c0_1 = arith.constant 0 : index
    %c0_2 = arith.constant 0 : index
    %7 = vector.load %arg6[%c0_1, %c0_2] : memref<16x128xf32, #tpu.memory_space<vmem>>, vector<16x128xf32>
    %c0_3 = arith.constant 0 : index
    %c0_4 = arith.constant 0 : index
    %8 = vector.load %arg2[%c0_3, %c0_4] : memref<256x128xbf16, #tpu.memory_space<vmem>>, vector<256x128xbf16>
    %cst = arith.constant dense<0.000000e+00> : vector<16x128xf32>
    %9 = tpu.matmul %6, %8, %cst {dimension_numbers = #tpu.dot_dimension_numbers<[1], [0], [0], [1], [0, 0, 1, 1], [], []>} : vector<16x256xbf16>, vector<256x128xbf16>, vector<16x128xf32> -> vector<16x128xf32>
    %10 = arith.addf %7, %9 : vector<16x128xf32>
    %c0_5 = arith.constant 0 : index
    %c0_6 = arith.constant 0 : index
    %11 = vector.load %arg6[%c0_5, %c0_6] : memref<16x128xf32, #tpu.memory_space<vmem>>, vector<16x128xf32>
    tpu.vector_store %arg6[%c0_5, %c0_6], %10 {strides = array<i32>} : memref<16x128xf32, #tpu.memory_space<vmem>>, vector<16x128xf32>,
    %c0_i32_7 = arith.constant 0 : i32
    %12 = arith.cmpi eq, %arg0, %c0_i32_7 : i32
    %13 = arith.extui %12 : i1 to i32
    %c0_i32_8 = arith.constant 0 : i32
    %14 = arith.cmpi ne, %13, %c0_i32_8 : i32
    scf.if %14 {
      %c0_9 = arith.constant 0 : index
      %c0_10 = arith.constant 0 : index
      %15 = vector.load %arg6[%c0_9, %c0_10] : memref<16x128xf32, #tpu.memory_space<vmem>>, vector<16x128xf32>
      %c0_11 = arith.constant 0 : index
      %c0_12 = arith.constant 0 : index
      %16 = vector.load %arg3[%c0_11, %c0_12] : memref<1x128xf32, #tpu.memory_space<vmem>>, vector<1x128xf32>
      %17 = vector.broadcast %16 : vector<1x128xf32> to vector<16x128xf32>
      %18 = arith.addf %15, %17 : vector<16x128xf32>
      %cst_13 = arith.constant 0.000000e+00 : f32
      %19 = vector.broadcast %cst_13 : f32 to vector<16x128xf32>
      %20 = arith.maximumf %18, %19 : vector<16x128xf32>
      %21 = vector.extract_strided_slice %20 {offsets = [0, 0], sizes = [8, 128], strides = [1, 1]} : vector<16x128xf32> to vector<8x128xf32>
      %22 = vector.extract_strided_slice %20 {offsets = [8, 0], sizes = [8, 128], strides = [1, 1]} : vector<16x128xf32> to vector<8x128xf32>
      %c0_14 = arith.constant 0 : index
      %c0_15 = arith.constant 0 : index
      %23 = vector.load %arg4[%c0_14, %c0_15] : memref<8x128xf32, #tpu.memory_space<vmem>>, vector<8x128xf32>
      %cst_16 = arith.constant dense<0.000000e+00> : vector<128x128xf32>
      %24 = tpu.matmul %21, %23, %cst_16 {dimension_numbers = #tpu.dot_dimension_numbers<[0], [0], [1], [1], [0, 1, 1, 1], [], []>} : vector<8x128xf32>, vector<8x128xf32>, vector<128x128xf32> -> vector<128x128xf32>
      %cst_17 = arith.constant dense<0.000000e+00> : vector<8x128xf32>
      %25 = tpu.matmul %22, %24, %cst_17 {dimension_numbers = #tpu.dot_dimension_numbers<[1], [0], [0], [1], [0, 0, 1, 1], [], []>} : vector<8x128xf32>, vector<128x128xf32>, vector<8x128xf32> -> vector<8x128xf32>
      %26 = arith.mulf %22, %22 : vector<8x128xf32>
      %cst_18 = arith.constant dense<0.000000e+00> : vector<8xf32>
      %27 = vector.multi_reduction <add>, %26, %cst_18 [1] : vector<8x128xf32> to vector<8xf32>
      %28 = vector.shape_cast %27 : vector<8xf32> to vector<8x1xf32>
      %29 = arith.mulf %24, %24 : vector<128x128xf32>
      %cst_19 = arith.constant dense<0.000000e+00> : vector<128xf32>
      %30 = vector.multi_reduction <add>, %29, %cst_19 [0] : vector<128x128xf32> to vector<128xf32>
      %31 = vector.shape_cast %30 : vector<128xf32> to vector<1x128xf32>
      %32 = vector.broadcast %28 : vector<8x1xf32> to vector<8x128xf32>
      %33 = vector.broadcast %31 : vector<1x128xf32> to vector<8x128xf32>
      %34 = arith.addf %32, %33 : vector<8x128xf32>
      %cst_20 = arith.constant 2.000000e+00 : f32
      %35 = vector.broadcast %cst_20 : f32 to vector<8x128xf32>
      %36 = arith.mulf %35, %25 : vector<8x128xf32>
      %37 = arith.subf %34, %36 : vector<8x128xf32>
      %cst_21 = arith.constant 0.000000e+00 : f32
      %38 = vector.broadcast %cst_21 : f32 to vector<8x128xf32>
      %39 = arith.subf %38, %37 : vector<8x128xf32>
      %c0_22 = arith.constant 0 : index
      %c0_23 = arith.constant 0 : index
      %40 = vector.load %arg5[%c0_22, %c0_23] : memref<8x128xf32, #tpu.memory_space<vmem>>, vector<8x128xf32>
      tpu.vector_store %arg5[%c0_22, %c0_23], %39 {strides = array<i32>} : memref<8x128xf32, #tpu.memory_space<vmem>>, vector<8x128xf32>,
    } else {
    }
    return
  }
  func.func @transform_0(%arg0: i32) -> (i32, i32) {
    %c0_i32 = arith.constant 0 : i32
    %c0_i32_0 = arith.constant 0 : i32
    %c0_i32_1 = arith.constant 0 : i32
    return %c0_i32, %c0_i32_0 : i32, i32
  }
  func.func @transform_1(%arg0: i32) -> (i32, i32) {
    %c0_i32 = arith.constant 0 : i32
    %c0_i32_0 = arith.constant 0 : i32
    return %arg0, %c0_i32 : i32, i32
  }
  func.func @transform_2(%arg0: i32) -> (i32, i32) {
    %c0_i32 = arith.constant 0 : i32
    %c0_i32_0 = arith.constant 0 : i32
    %c0_i32_1 = arith.constant 0 : i32
    return %c0_i32, %c0_i32_0 : i32, i32
  }
  func.func @transform_3(%arg0: i32) -> (i32, i32) {
    %c0_i32 = arith.constant 0 : i32
    %c0_i32_0 = arith.constant 0 : i32
    %c0_i32_1 = arith.constant 0 : i32
    return %c0_i32, %c0_i32_0 : i32, i32
  }
  func.func @transform_4(%arg0: i32) -> (i32, i32) {
    %c0_i32 = arith.constant 0 : i32
    %c0_i32_0 = arith.constant 0 : i32
    %c0_i32_1 = arith.constant 0 : i32
    return %c0_i32, %c0_i32_0 : i32, i32
  }
}

</mosaic_0001>

<bundles_post_ra>
// kernel: tpu_custom_call.1
= control target key start
LH: loop header
LB: loop body
LE: loop exit
PB: predicated region body
PF: predicated region fallthrough
CT: control target
= control target key end

     0   :  { %9 = vsyncpa [#allocation4], 0  ;;  %s782_s0 = inlined_call_operand.hbm [shape: bf16[16,256], index: 0, kind: input, shape index: {}]   ;;  %s783_s1 = inlined_call_operand.hbm [shape: bf16[256,128], index: 1, kind: input, shape index: {}]   ;;  %s784_s2 = inlined_call_operand.vmem [shape: f32[1,128], index: 2, kind: input, shape index: {}]   ;;  %s785_s3 = inlined_call_operand.hbm [shape: f32[8,128], index: 3, kind: input, shape index: {}]   ;;  %s786_s4 = inlined_call_operand.hbm [shape: f32[8,128], index: 4, kind: output, shape index: {}]  }
   0x1   :  { %10 = vsyncpa [#allocation7], 0  ;;  %s29_s17 = sshll.u32 %s783_s1, 4  ;;  %s30_s17 = int_to_ptr.hbm [resolvable:$true] %s29_s17 }
   0x2   :  { %11 = vsyncpa [#allocation5], 0  ;;  %s713_s18 = smov [#allocation6]   ;;  %s16_s22 = sshll.u32 %s782_s0, 4  ;;  %s17_s22 = int_to_ptr.hbm [resolvable:$true] %s16_s22 }
   0x3   :  { %s31_s19 = sshll.u32 %s713_s18, 4  ;;  %s714_s23 = smov 64   ;;  %s32_s19 = int_to_ptr.vmem [resolvable:$true] %s31_s19 }
   0x4   :  { %s715_s24 = smov 4   ;;  %s716_s25 = smov [#allocation3]  }
   0x5   :  { %37 = dma.hbm_to_vmem [thread:$0]  %s30_s17, 2048, %s32_s19, [#allocation7], %s714_s23, %s714_s23, %s715_s24  }
   0x6   :  { %s18_s26 = sshll.u32 %s716_s25, 4  ;;  %s717_s27 = smov 128   ;;  %s19_s26 = int_to_ptr.vmem [resolvable:$true] %s18_s26 }
   0x7   :  { %s718_s28 = smov 8   ;;  %s45_s30 = sshll.u32 %s785_s3, 4  ;;  %s46_s30 = int_to_ptr.hbm [resolvable:$true] %s45_s30 }
   0x8   :  { %24 = dma.hbm_to_vmem [thread:$0]  %s17_s22, 256, %s19_s26, [#allocation4], %s717_s27, %s717_s27, %s718_s28  }
   0x9   :  { %s719_s5 = smov [#allocation8]  }
   0xa   :  { %s47_s6 = sshll.u32 %s719_s5, 4  ;;  %s48_s6 = int_to_ptr.vmem [resolvable:$true] %s47_s6 }
   0xb   :  { %50 = dma.hbm_to_vmem [thread:$0]  %s46_s30, 128, %s48_s6, [#allocation7]  }
   0xc   :  { %707 = dma.done.wait [#allocation4], 256  }
   0xd   :  { %708 = vsyncadd [#allocation4], 4294967040 }
   0xe   :  { %709 = dma.done.wait [#allocation7], 2176  }
   0xf   :  { %710 = vsyncadd [#allocation7], 4294965120  ;;  %v590_v0 = vld [vmem:[#allocation6 + $0x38] sm:$0xff]  ;;  %v589_v2 = vld [vmem:[#allocation6 + $0x30] sm:$0xff]  ;;  %vm294_vm0 = vcmask 64512   ;;  %s480_s10 = sshll.u32 %s786_s4, 4  ;;  %s481_s10 = int_to_ptr.hbm [resolvable:$true] %s480_s10 }
  0x10   :  { %v598_v1 = vld [vmem:[#allocation6 + $0x78] sm:$0xff]  ;;  %216 = vmatpush.bf16.msra.mxu0 %v590_v0  ;;  %v597_v3 = vld [vmem:[#allocation6 + $0x70] sm:$0xff]  ;;  %v588_v4 = vld [vmem:[#allocation6 + $0x28] sm:$0xff] }
  0x11   :  { %230 = vmatpush.bf16.msra.mxu1 %v598_v1  ;;  %v596_v5 = vld [vmem:[#allocation6 + $0x68] sm:$0xff]  ;;  %v587_v6 = vld [vmem:[#allocation6 + $0x20] sm:$0xff]  ;;  %v586_v8 = vld [vmem:[#allocation6 + $0x18] sm:$0xff] }
  0x12   :  { %v595_v7 = vld [vmem:[#allocation6 + $0x60] sm:$0xff]  ;;  %v594_v9 = vld [vmem:[#allocation6 + $0x58] sm:$0xff]  ;;  %v585_v10 = vld [vmem:[#allocation6 + $0x10] sm:$0xff] }
  0x13   :  { %v593_v11 = vld [vmem:[#allocation6 + $0x50] sm:$0xff]  ;;  %v584_v12 = vld [vmem:[#allocation6 + $0x8] sm:$0xff]  ;;  %v583_v14 = vld [vmem:[#allocation6] sm:$0xff] }
  0x14   :  { %217 = vmatpush.bf16.msra.mxu0 %v589_v2  ;;  %v592_v13 = vld [vmem:[#allocation6 + $0x48] sm:$0xff]  ;;  %v591_v15 = vld [vmem:[#allocation6 + $0x40] sm:$0xff]  ;;  %v495_v16 = vld [vmem:[#allocation3] sm:$0xf] }
  0x15   :  { %231 = vmatpush.bf16.msra.mxu1 %v597_v3  ;;  %v582_v17 = vld [vmem:[#allocation3 + $0x4] sm:$0xf0]  ;;  %v581_v18 = vld [vmem:[#allocation3 + $0x4] sm:$0xf]  ;;  %v497_v19 = vld [vmem:[#allocation3 + $0x8] sm:$0xf0] }
  0x16   :  { %v496_v20 = vor.u32 %v582_v17, %v495_v16  ;;  %v500_v21 = vor.u32 %v581_v18, %v497_v19  ;;  %v261_v22 = vld [vmem:[#allocation8] sm:$0xff]  ;;  %v610_v23 = vld [vmem:[%s784_s2] ss:$0 sm:$0xff]  ;;  %s720_s2 = smov [#allocation9]  }
  0x17   :  { %599 = vmatpush.msra.mxu2 %v261_v22  ;;  %600 = vmatpush.msra.mxu3 %v261_v22  ;;  %s478_s7 = sshll.u32 %s720_s2, 4  ;;  %s479_s7 = int_to_ptr.vmem [resolvable:$true] %s478_s7 }
  0x18   :  { %218 = vmatpush.bf16.msra.mxu0 %v588_v4 }
  0x19   :  { %232 = vmatpush.bf16.msra.mxu1 %v596_v5 }
  0x1c   :  { %219 = vmatpush.bf16.msra.mxu0 %v587_v6 }
  0x1d   :  { %233 = vmatpush.bf16.msra.mxu1 %v595_v7 }
  0x20   :  { %220 = vmatpush.bf16.msra.mxu0 %v586_v8 }
  0x21   :  { %234 = vmatpush.bf16.msra.mxu1 %v594_v9 }
  0x24   :  { %221 = vmatpush.bf16.msra.mxu0 %v585_v10 }
  0x25   :  { %235 = vmatpush.bf16.msra.mxu1 %v593_v11 }
  0x28   :  { %222 = vmatpush.bf16.msra.mxu0 %v584_v12 }
  0x29   :  { %236 = vmatpush.bf16.msra.mxu1 %v592_v13 }
  0x2c   :  { %223 = vmatpush.bf16.msra.mxu0 %v583_v14 }
  0x2d   :  { %237 = vmatpush.bf16.msra.mxu1 %v591_v15 }
  0x2f   :  { %224 = vmatmul.bf16.vlgmr.msra.gmra.mxu0 %v496_v20 }
  0x30   :  { %238 = vmatmul.bf16.vlgmr.msra.gmra.mxu1 %v500_v21  ;;  %358 = vmatpush.msrb.mxu0 %v261_v22 }
  0xac   :  { %v225_v24 = vpop.f32.mrf.mxu0 }
  0xad   :  { %v239_v25 = vpop.f32.mrf.mxu1 }
  0xae   :  { %v240_v26 = vadd.f32 %v239_v25, %v225_v24 }
  0xb0   :  { %v257_v27 = vadd.f32 %v610_v23, %v240_v26 }
  0xb2   :  { %v259_v28 = vmax.f32 %v257_v27, 0.0 }
  0xb4   :  { %262 = vxpose.xlu0.b32.start.end [1/1] (short) %v259_v28, 128  ;;  %v227_v36 = vpop.f32.mrf.mxu0 }
  0xb5   :  { %v241_v37 = vpop.f32.mrf.mxu1 }
  0xb6   :  { %v242_v38 = vadd.f32 %v241_v37, %v227_v36 }
  0xb8   :  { %v258_v40 = vadd.f32 %v610_v23, %v242_v38 }
  0xba   :  { %v766_v41 = vmax.f32 %v258_v40, 0.0 }
  0xbc   :  { %v428_v43 = vmul.f32 %v766_v41, %v766_v41 }
 0x158   :  { %v278_v29 = vpop.trf.xlu0 }
 0x159   :  { %565 = vmatmul.msk.f32.vlgmr.msrb.gmra.mxu0 %vm294_vm0, %v278_v29 }
 0x160   :  { %v279_v30 = vpop.trf.xlu0 }
 0x161   :  { %566 = vmatmul.msk.f32.vlgmr.msra.gmra.mxu2 %vm294_vm0, %v279_v30 }
 0x168   :  { %v280_v31 = vpop.trf.xlu0 }
 0x169   :  { %567 = vmatmul.msk.f32.gmra.mxu2 %vm294_vm0, %v280_v31 }
 0x170   :  { %v281_v32 = vpop.trf.xlu0 }
 0x171   :  { %568 = vmatmul.msk.f32.gmra.mxu2 %vm294_vm0, %v281_v32 }
 0x178   :  { %v282_v33 = vpop.trf.xlu0 }
 0x179   :  { %569 = vmatmul.msk.f32.gmra.mxu2 %vm294_vm0, %v282_v33 }
 0x180   :  { %v283_v34 = vpop.trf.xlu0 }
 0x181   :  { %570 = vmatmul.msk.f32.gmra.mxu2 %vm294_vm0, %v283_v34 }
 0x188   :  { %v284_v35 = vpop.trf.xlu0 }
 0x189   :  { %571 = vmatmul.msk.f32.gmra.mxu2 %vm294_vm0, %v284_v35 }
 0x190   :  { %v285_v39 = vpop.trf.xlu0 }
 0x191   :  { %572 = vmatmul.msk.f32.gmra.mxu2 %vm294_vm0, %v285_v39 }
 0x198   :  { %v286_v42 = vpop.trf.xlu0 }
 0x199   :  { %573 = vmatmul.msk.f32.gmra.mxu2 %vm294_vm0, %v286_v42 }
 0x19d   :  { %429 = vadd.xlane.f32.xlu0 %v428_v43 }
 0x1a0   :  { %v287_v44 = vpop.trf.xlu0 }
 0x1a1   :  { %574 = vmatmul.msk.f32.vlgmr.msra.gmra.mxu3 %vm294_vm0, %v287_v44 }
 0x1a8   :  { %v288_v45 = vpop.trf.xlu0 }
 0x1a9   :  { %575 = vmatmul.msk.f32.gmra.mxu3 %vm294_vm0, %v288_v45 }
 0x1b0   :  { %v289_v46 = vpop.trf.xlu0 }
 0x1b1   :  { %576 = vmatmul.msk.f32.gmra.mxu3 %vm294_vm0, %v289_v46 }
 0x1b8   :  { %v290_v47 = vpop.trf.xlu0 }
 0x1b9   :  { %577 = vmatmul.msk.f32.gmra.mxu3 %vm294_vm0, %v290_v47 }
 0x1c0   :  { %v291_v48 = vpop.trf.xlu0 }
 0x1c1   :  { %578 = vmatmul.msk.f32.gmra.mxu3 %vm294_vm0, %v291_v48 }
 0x1c8   :  { %v292_v49 = vpop.trf.xlu0 }
 0x1c9   :  { %579 = vmatmul.msk.f32.gmra.mxu3 %vm294_vm0, %v292_v49 }
 0x1d0   :  { %v293_v50 = vpop.trf.xlu0 }
 0x1d1   :  { %580 = vmatmul.msk.f32.gmra.mxu3 %vm294_vm0, %v293_v50 }
 0x1d6   :  { %v360_v57 = vpop.f32.mrf.mxu0 }
 0x1d7   :  { %v431_v60 = vmul.f32 %v360_v57, %v360_v57 }
 0x1e4   :  { %v363_v51 = vpop.f32.mrf.mxu2 }
 0x1e5   :  { %v432_v58 = vmul.f32 %v363_v51, %v363_v51 }
 0x1e7   :  { %v447_v62 = vadd.f32 %v432_v58, %v431_v60 }
 0x1ec   :  { %v366_v52 = vpop.f32.mrf.mxu2 }
 0x1ed   :  { %v433_v61 = vmul.f32 %v366_v52, %v366_v52 }
 0x1ef   :  { %v448_v0 = vadd.f32 %v447_v62, %v433_v61 }
 0x1f4   :  { %v369_v53 = vpop.f32.mrf.mxu2 }
 0x1f5   :  { %v434_v63 = vmul.f32 %v369_v53, %v369_v53 }
 0x1f7   :  { %v449_v2 = vadd.f32 %v448_v0, %v434_v63 }
 0x1fc   :  { %v372_v54 = vpop.f32.mrf.mxu2 }
 0x1fd   :  { %v435_v1 = vmul.f32 %v372_v54, %v372_v54 }
 0x1ff   :  { %v450_v4 = vadd.f32 %v449_v2, %v435_v1 }
 0x204   :  { %v375_v55 = vpop.f32.mrf.mxu2 }
 0x205   :  { %v436_v3 = vmul.f32 %v375_v55, %v375_v55 }
 0x207   :  { %v451_v8 = vadd.f32 %v450_v4, %v436_v3 }
 0x20c   :  { %v378_v56 = vpop.f32.mrf.mxu2 }
 0x20d   :  { %v437_v5 = vmul.f32 %v378_v56, %v378_v56 }
 0x20f   :  { %v452_v10 = vadd.f32 %v451_v8, %v437_v5 }
 0x210   :  { %v430_v40 = vpop.xlane.xlu0 %429 }
 0x214   :  { %v381_v59 = vpop.f32.mrf.mxu2 }
 0x215   :  { %v438_v9 = vmul.f32 %v381_v59, %v381_v59 }
 0x217   :  { %v453_v12 = vadd.f32 %v452_v10, %v438_v9 }
 0x21c   :  { %v384_v6 = vpop.f32.mrf.mxu2 }
 0x21d   :  { %v439_v11 = vmul.f32 %v384_v6, %v384_v6 }
 0x21f   :  { %v454_v14 = vadd.f32 %v453_v12, %v439_v11 }
 0x224   :  { %v387_v7 = vpop.f32.mrf.mxu3 }
 0x225   :  { %v440_v13 = vmul.f32 %v387_v7, %v387_v7 }
 0x227   :  { %v455_v16 = vadd.f32 %v454_v14, %v440_v13 }
 0x22c   :  { %v390_v15 = vpop.f32.mrf.mxu3 }
 0x22d   :  { %v441_v17 = vmul.f32 %v390_v15, %v390_v15 }
 0x22f   :  { %v456_v18 = vadd.f32 %v455_v16, %v441_v17 }
 0x234   :  { %v393_v19 = vpop.f32.mrf.mxu3 }
 0x235   :  { %v442_v20 = vmul.f32 %v393_v19, %v393_v19 }
 0x237   :  { %v457_v21 = vadd.f32 %v456_v18, %v442_v20 }
 0x23c   :  { %v396_v22 = vpop.f32.mrf.mxu3 }
 0x23d   :  { %v443_v23 = vmul.f32 %v396_v22, %v396_v22 }
 0x23f   :  { %v458_v24 = vadd.f32 %v457_v21, %v443_v23 }
 0x244   :  { %v399_v25 = vpop.f32.mrf.mxu3 }
 0x245   :  { %v444_v26 = vmul.f32 %v399_v25, %v399_v25 }
 0x247   :  { %v459_v27 = vadd.f32 %v458_v24, %v444_v26 }
 0x24c   :  { %v402_v28 = vpop.f32.mrf.mxu3 }
 0x24d   :  { %v445_v29 = vmul.f32 %v402_v28, %v402_v28 }
 0x24f   :  { %v460_v30 = vadd.f32 %v459_v27, %v445_v29 }
 0x254   :  { %v405_v31 = vpop.f32.mrf.mxu3 }
 0x255   :  { %408 = vmatpush.msrb.mxu3 %v405_v31  ;;  %v446_v32 = vmul.f32 %v405_v31, %v405_v31 }
 0x257   :  { %409 = vmatpush.msrb.mxu3 %v402_v28  ;;  %v461_v33 = vadd.f32 %v460_v30, %v446_v32 }
 0x259   :  { %410 = vmatpush.msrb.mxu3 %v399_v25  ;;  %v462_v34 = vrot.slane %v461_v33, 4 }
 0x25b   :  { %411 = vmatpush.msrb.mxu3 %v396_v22  ;;  %v463_v35 = vadd.f32 %v462_v34, %v461_v33 }
 0x25d   :  { %412 = vmatpush.msrb.mxu3 %v393_v19  ;;  %v464_v36 = vrot.slane %v463_v35, 2 }
 0x25f   :  { %413 = vmatpush.msrb.mxu3 %v390_v15  ;;  %v465_v37 = vadd.f32 %v464_v36, %v463_v35 }
 0x261   :  { %414 = vmatpush.msrb.mxu3 %v387_v7  ;;  %v466_v38 = vrot.slane %v465_v37, 1 }
 0x263   :  { %415 = vmatpush.msrb.mxu3 %v384_v6  ;;  %v467_v39 = vadd.f32 %v466_v38, %v465_v37 }
 0x265   :  { %416 = vmatpush.msrb.mxu3 %v381_v59  ;;  %v468_v43 = vadd.f32 %v467_v39, %v430_v40 }
 0x267   :  { %417 = vmatpush.msrb.mxu3 %v378_v56 }
 0x269   :  { %418 = vmatpush.msrb.mxu3 %v375_v55 }
 0x26b   :  { %419 = vmatpush.msrb.mxu3 %v372_v54 }
 0x26d   :  { %420 = vmatpush.msrb.mxu3 %v369_v53 }
 0x26f   :  { %421 = vmatpush.msrb.mxu3 %v366_v52 }
 0x271   :  { %422 = vmatpush.msrb.mxu3 %v363_v51 }
 0x273   :  { %423 = vmatpush.msrb.mxu3 %v360_v57 }
 0x274   :  { %424 = vmatmul.f32.vlgmr.msrb.gmra.mxu3 %v766_v41 }
 0x2f7   :  { %v425_v42 = vpop.f32.mrf.mxu3 }
 0x2f8   :  { %v469_v44 = vmul.f32 2.0, %v425_v42 }
 0x2fa   :  { %v470_v45 = vsub.f32 %v468_v43, %v469_v44 }
 0x2fc   :  { %v471_v41 = vsub.f32 0.0, %v470_v45 }
 0x2fe   :  { %472 = vst [vmem:[#allocation9] sm:$0xff] %v471_v41 }
 0x2ff   :  { %483 = dma.vmem_to_hbm [thread:$0]  %s479_s7, 128, %s481_s10, [#allocation5]  }
 0x300   :  { %711 = dma.done.wait [#allocation5], 128  }
 0x301   :  { %712 = vsyncadd [#allocation5], 4294967168 }
 0x302   :  { %488 = vsyncpa [#allocation4], 1 }
 0x303   :  { %489 = vsyncpa [#allocation7], 1 }
 0x304   :  { %490 = vsyncpa [#allocation5], 1 }

</bundles_post_ra>
